<compile_context>
chip_gen: v6e
topology: v6e:2x2x1
jax: 0.10.0
libtpu: 0.0.40
codegen_flags: <defaults>
</compile_context>

<pallas_src>
import functools

import jax
import jax.numpy as jnp
from jax import lax
from jax.experimental import pallas as pl
from jax.experimental.pallas import tpu as pltpu


# ----------------------------------------------------------------------------
# Kernel: one grid step handles `block_b` directions against a shared w_0.
# alpha_ref : (B_pad,) f32 in SMEM (whole array)
# w0_ref    : (R, C)   in VMEM, same block every step (VMEM-resident)
# idd_ref   : (block_b, R, C) in VMEM
# o_ref     : (block_b, R, C) in VMEM
# ----------------------------------------------------------------------------
def _idd_batched_kernel(alpha_ref, w0_ref, idd_ref, o_ref, *, block_b):
    g = pl.program_id(0)
    base = g * block_b
    w0 = w0_ref[...].astype(jnp.float32)            # loaded once per step, shared

    # Static unroll over the directions in this block: each iteration is fully
    # vectorized over the (R, C) slab; alphas come from SMEM as free scalars.
    for b in range(block_b):
        idd_b = idd_ref[b].astype(jnp.float32)       # (R, C)
        sumsq = jnp.sum(idd_b * idd_b)               # full-tensor ||idd_b||^2
        scale = alpha_ref[base + b] * lax.rsqrt(sumsq)   # alpha_b / ||idd_b||
        o_ref[b] = (w0 + idd_b * scale).astype(o_ref.dtype)


# ----------------------------------------------------------------------------
# Batched wrapper: B directions, ONE shared w_0, ONE pallas_call.
# ----------------------------------------------------------------------------
def id_invariant_direction_batched(w_0, idd, alphas, *, block_b=16):
    """out[b] = w_0 + alphas[b] * idd[b] / ||idd[b]||_2.

    w_0:    (R, C)    shared base latent
    idd:    (B, R, C) directions
    alphas: (B,)      per-direction scales
    """
    R, C = w_0.shape
    B = idd.shape[0]
    alphas = jnp.asarray(alphas, jnp.float32).reshape(B)

    # v7x has 2 TensorCores: keep >= 2 parallel grid steps whenever B >= 2.
    if B >= 2:
        block_b = min(block_b, pl.cdiv(B, 2))
    block_b = max(1, min(block_b, B))

    num_blocks = pl.cdiv(B, block_b)
    b_pad = num_blocks * block_b
    if b_pad != B:
        # Pad with ones (finite norm) and alpha=0 so padded rows are just w_0;
        # they are sliced away below.
        idd = jnp.concatenate(
            [idd, jnp.ones((b_pad - B, R, C), idd.dtype)], axis=0)
        alphas = jnp.concatenate(
            [alphas, jnp.zeros((b_pad - B,), jnp.float32)], axis=0)

    out = pl.pallas_call(
        functools.partial(_idd_batched_kernel, block_b=block_b),
        out_shape=jax.ShapeDtypeStruct((b_pad, R, C), w_0.dtype),
        grid=(num_blocks,),
        in_specs=[
            pl.BlockSpec(memory_space=pltpu.SMEM),               # alphas (whole, SMEM)
            pl.BlockSpec((R, C), lambda g: (0, 0)),              # shared w_0 (resident)
            pl.BlockSpec((block_b, R, C), lambda g: (g, 0, 0)),  # idd block
        ],
        out_specs=pl.BlockSpec((block_b, R, C), lambda g: (g, 0, 0)),
        compiler_params=pltpu.CompilerParams(
            dimension_semantics=("parallel",)),
    )(alphas, w_0, idd)

    return out[:B] if b_pad != B else out


# ----------------------------------------------------------------------------
# Single-direction entry (matches the PyTorch module's forward(alpha)).
# Routed through the batched kernel with B=1.
# ----------------------------------------------------------------------------
def id_invariant_direction(w_0, idd, alpha):
    """out = w_0 + alpha * idd / ||idd||_2."""
    alpha_arr = jnp.asarray(alpha, jnp.float32).reshape(1)
    out = id_invariant_direction_batched(w_0, idd[None], alpha_arr, block_b=1)
    return out[0]


if __name__ == "__main__":
    key = jax.random.PRNGKey(0)
    k_w0, k_idd, k_iddb = jax.random.split(key, 3)

    # Module shapes: w_space_dims = (18, 512); w_0 is a base latent of same shape.
    R, C = 18, 512
    w_0 = jax.random.normal(k_w0, (R, C), dtype=jnp.float32)
    idd = jax.random.normal(k_idd, (R, C), dtype=jnp.float32)   # nn.Parameter(torch.randn(...))
    alpha = 0.7

    out = jax.block_until_ready(id_invariant_direction(w_0, idd, alpha))
    ref = w_0 + alpha * (idd / jnp.sqrt(jnp.sum(idd * idd)))
    assert out.shape == (R, C)
    assert jnp.allclose(out, ref, atol=1e-5, rtol=1e-5), "single-direction mismatch"

    # Batched path: B directions against the SAME shared w_0 in one pallas_call.
    # B=5 with block_b=2 -> 3 parallel grid steps and exercises the padding path.
    B = 5
    iddb = jax.random.normal(k_iddb, (B, R, C), dtype=jnp.float32)
    alphas = jnp.linspace(0.2, 1.1, B, dtype=jnp.float32)

    outb = jax.block_until_ready(
        id_invariant_direction_batched(w_0, iddb, alphas, block_b=2))
    norms = jnp.sqrt(jnp.sum(iddb * iddb, axis=(1, 2), keepdims=True))
    refb = w_0[None] + alphas[:, None, None] * (iddb / norms)
    assert outb.shape == (B, R, C)
    assert jnp.allclose(outb, refb, atol=1e-5, rtol=1e-5), "batched mismatch"

    print("KERNEL_OK")
</pallas_src>

<mosaic_0001>
module attributes {stable_mosaic.version = 11 : i64} {
  func.func @_idd_batched_kernel(%arg0: i32, %arg1: memref<1xf32, #tpu.memory_space<smem>>, %arg2: memref<18x512xf32, #tpu.memory_space<vmem>>, %arg3: memref<1x18x512xf32, #tpu.memory_space<vmem>>, %arg4: memref<1x18x512xf32, #tpu.memory_space<vmem>>) attributes {dimension_semantics = [#tpu.dimension_semantics<parallel>], iteration_bounds = array<i64: 1>, scalar_prefetch = 0 : i64, scratch_operands = 0 : i64, tpu.core_type = #tpu.core_type<tc>, window_params = [{transform_indices = @transform_0, window_bounds = array<i64: 1>}, {pipeline_mode = #tpu.pipeline_mode<synchronous>, transform_indices = @transform_1, window_bounds = array<i64: 18, 512>}, {transform_indices = @transform_2, window_bounds = array<i64: 1, 18, 512>}, {transform_indices = @transform_3, window_bounds = array<i64: 1, 18, 512>}]} {
    %c1_i32 = arith.constant 1 : i32
    %0 = arith.muli %arg0, %c1_i32 : i32
    %c0 = arith.constant 0 : index
    %c0_0 = arith.constant 0 : index
    %1 = vector.load %arg2[%c0, %c0_0] : memref<18x512xf32, #tpu.memory_space<vmem>>, vector<18x512xf32>
    %c0_1 = arith.constant 0 : index
    %c0_2 = arith.constant 0 : index
    %c0_3 = arith.constant 0 : index
    %2 = vector.load %arg3[%c0_1, %c0_2, %c0_3] : memref<1x18x512xf32, #tpu.memory_space<vmem>>, vector<1x18x512xf32>
    %3 = vector.shape_cast %2 : vector<1x18x512xf32> to vector<18x512xf32>
    %4 = arith.mulf %3, %3 : vector<18x512xf32>
    %5 = vector.shape_cast %4 : vector<18x512xf32> to vector<1x18x512xf32>
    %cst = arith.constant dense<0.000000e+00> : vector<1xf32>
    %6 = vector.multi_reduction <add>, %5, %cst [1, 2] : vector<1x18x512xf32> to vector<1xf32>
    %7 = vector.shape_cast %6 : vector<1xf32> to vector<1x1x1xf32>
    %8 = vector.extract %7[0, 0, 0] : f32 from vector<1x1x1xf32>
    %c0_i32 = arith.constant 0 : i32
    %9 = arith.addi %0, %c0_i32 : i32
    %10 = arith.index_cast %9 : i32 to index
    %11 = memref.load %arg1[%10] : memref<1xf32, #tpu.memory_space<smem>>
    %12 = math.rsqrt %8 : f32
    %13 = arith.mulf %11, %12 : f32
    %14 = vector.broadcast %13 : f32 to vector<18x512xf32>
    %15 = arith.mulf %3, %14 : vector<18x512xf32>
    %16 = arith.addf %1, %15 : vector<18x512xf32>
    %c0_4 = arith.constant 0 : index
    %c0_5 = arith.constant 0 : index
    %c0_6 = arith.constant 0 : index
    %17 = vector.load %arg4[%c0_4, %c0_5, %c0_6] : memref<1x18x512xf32, #tpu.memory_space<vmem>>, vector<1x18x512xf32>
    %18 = vector.shape_cast %17 : vector<1x18x512xf32> to vector<18x512xf32>
    %19 = vector.shape_cast %16 : vector<18x512xf32> to vector<1x18x512xf32>
    tpu.vector_store %arg4[%c0_4, %c0_5, %c0_6], %19 {strides = array<i32>} : memref<1x18x512xf32, #tpu.memory_space<vmem>>, vector<1x18x512xf32>,
    return
  }
  func.func @transform_0(%arg0: i32) -> i32 {
    %c0_i32 = arith.constant 0 : i32
    %c0_i32_0 = arith.constant 0 : i32
    return %c0_i32 : i32
  }
  func.func @transform_1(%arg0: i32) -> (i32, i32) {
    %c0_i32 = arith.constant 0 : i32
    %c0_i32_0 = arith.constant 0 : i32
    %c0_i32_1 = arith.constant 0 : i32
    return %c0_i32, %c0_i32_0 : i32, i32
  }
  func.func @transform_2(%arg0: i32) -> (i32, i32, i32) {
    %c0_i32 = arith.constant 0 : i32
    %c0_i32_0 = arith.constant 0 : i32
    %c0_i32_1 = arith.constant 0 : i32
    return %arg0, %c0_i32, %c0_i32_0 : i32, i32, i32
  }
  func.func @transform_3(%arg0: i32) -> (i32, i32, i32) {
    %c0_i32 = arith.constant 0 : i32
    %c0_i32_0 = arith.constant 0 : i32
    %c0_i32_1 = arith.constant 0 : i32
    return %arg0, %c0_i32, %c0_i32_0 : i32, i32, i32
  }
}

</mosaic_0001>

<bundles_post_ra>
// kernel: tpu_custom_call.1
= control target key start
LH: loop header
LB: loop body
LE: loop exit
PB: predicated region body
PF: predicated region fallthrough
CT: control target
= control target key end

     0   :  { %vm58_vm0 = vcmask 1041408   ;;  %s299_s2 = inlined_call_operand.vmem [shape: f32[1,18,512], index: 2, kind: input, shape index: {}]   ;;  %s300_s0 = inlined_call_operand.<no memory space> [shape: f32[1], index: 0, kind: input, shape index: {}]   ;;  %s301_s1 = inlined_call_operand.vmem [shape: f32[18,512], index: 1, kind: input, shape index: {}]   ;;  %s302_s3 = inlined_call_operand.vmem [shape: f32[1,18,512], index: 3, kind: output, shape index: {}]  }
   0x1   :  { %v151_v0 = vld [vmem:[%s299_s2] sm:$0xff]  ;;  %v156_v1 = vld [vmem:[%s299_s2 + $0x8] sm:$0xff]  ;;  %v161_v2 = vld [vmem:[%s299_s2 + $0x10] sm:$0xff] }
   0x2   :  { %v166_v3 = vld [vmem:[%s299_s2 + $0x18] sm:$0xff]  ;;  %v39_v4 = vmul.f32 %v151_v0, %v151_v0  ;;  %v40_v5 = vmul.f32 %v156_v1, %v156_v1  ;;  %v41_v6 = vmul.f32 %v161_v2, %v161_v2  ;;  %v177_v7 = vld [vmem:[%s299_s2 + $0x20] sm:$0xff]  ;;  %v184_v10 = vld [vmem:[%s299_s2 + $0x28] sm:$0xff] }
   0x3   :  { %v42_v8 = vmul.f32 %v166_v3, %v166_v3  ;;  %v43_v11 = vmul.f32 %v177_v7, %v177_v7  ;;  %v33_v13 = vld [vmem:[%s299_s2 + $0x30] sm:$0xff]  ;;  %v194_v14 = vld [vmem:[%s299_s2 + $0x40] sm:$0x3]  ;;  %v44_v15 = vmul.f32 %v184_v10, %v184_v10  ;;  %v34_v17 = vld [vmem:[%s299_s2 + $0x38] sm:$0xff] }
   0x4   :  { %v51_v9 = vadd.f32 %v40_v5, %v39_v4  ;;  %v204_v18 = vld [vmem:[%s299_s2 + $0x48] sm:$0x3]  ;;  %v45_v19 = vmul.f32 %v33_v13, %v33_v13  ;;  %v47_v21 = vmul.f32 %v194_v14, %v194_v14  ;;  %v37_v22 = vld [vmem:[%s299_s2 + $0x50] sm:$0x3]  ;;  %v46_v23 = vmul.f32 %v34_v17, %v34_v17  ;;  %v38_v26 = vld [vmem:[%s299_s2 + $0x58] sm:$0x3] }
   0x5   :  { %v48_v25 = vmul.f32 %v204_v18, %v204_v18  ;;  %v49_v28 = vmul.f32 %v37_v22, %v37_v22  ;;  %v50_v31 = vmul.f32 %v38_v26, %v38_v26  ;;  %v15_v48 = vld [vmem:[%s301_s1] sm:$0xff]  ;;  %v16_v49 = vld [vmem:[%s301_s1 + $0x8] sm:$0xff]  ;;  %v17_v50 = vld [vmem:[%s301_s1 + $0x10] sm:$0xff] }
   0x6   :  { %v52_v12 = vadd.f32 %v51_v9, %v41_v6  ;;  %v59_v29 = vsel %vm58_vm0, %v47_v21, 0.0  ;;  %v18_v52 = vld [vmem:[%s301_s1 + $0x18] sm:$0xff]  ;;  %v19_v53 = vld [vmem:[%s301_s1 + $0x20] sm:$0xff]  ;;  %v20_v54 = vld [vmem:[%s301_s1 + $0x28] sm:$0xff] }
   0x7   :  { %v61_v32 = vsel %vm58_vm0, %v48_v25, 0.0  ;;  %v63_v34 = vsel %vm58_vm0, %v49_v28, 0.0  ;;  %v65_v36 = vsel %vm58_vm0, %v50_v31, 0.0  ;;  %v21_v59 = vld [vmem:[%s301_s1 + $0x30] sm:$0xff]  ;;  %v22_v60 = vld [vmem:[%s301_s1 + $0x38] sm:$0xff] }
   0x8   :  { %v53_v16 = vadd.f32 %v52_v12, %v42_v8  ;;  %v23_v61 = vld [vmem:[%s301_s1 + $0x40] sm:$0x3]  ;;  %v26_v4 = vld [vmem:[%s301_s1 + $0x58] sm:$0x3] }
   0xa   :  { %v54_v20 = vadd.f32 %v53_v16, %v43_v11 }
   0xc   :  { %v55_v24 = vadd.f32 %v54_v20, %v44_v15 }
   0xe   :  { %v56_v27 = vadd.f32 %v55_v24, %v45_v19 }
  0x10   :  { %v57_v30 = vadd.f32 %v56_v27, %v46_v23 }
  0x12   :  { %v60_v33 = vadd.f32 %v59_v29, %v57_v30 }
  0x14   :  { %v62_v35 = vadd.f32 %v61_v32, %v60_v33 }
  0x16   :  { %v64_v37 = vadd.f32 %v63_v34, %v62_v35 }
  0x18   :  { %v66_v38 = vadd.f32 %v65_v36, %v64_v37 }
  0x1a   :  { %67 = vadd.xlane.f32.xlu0 %v66_v38 }
  0xa3   :  { %v68_v39 = vpop.xlane.xlu0 %67 }
  0xa4   :  { %v69_v40 = vrot.slane %v68_v39, 4 }
  0xa6   :  { %v70_v41 = vadd.f32 %v69_v40, %v68_v39 }
  0xa8   :  { %v71_v42 = vrot.slane %v70_v41, 2 }
  0xaa   :  { %v72_v43 = vadd.f32 %v71_v42, %v70_v41 }
  0xac   :  { %v73_v44 = vrot.slane %v72_v43, 1 }
  0xae   :  { %v74_v45 = vadd.f32 %v73_v44, %v72_v43 }
  0xb0   :  { %122 = vpush %v74_v45 }
  0xe1   :  { %s123_s2 = spop %122 }
  0xe2   :  { %v77_v46 = vstv %s123_s2 }
  0xe3   :  { %126 = vrsqrt.f32 %v77_v46 }
  0xf0   :  { %v127_v47 = vpop.eup %126 }
  0xf1   :  { %124 = vpush %v127_v47 }
 0x122   :  { %s125_s9 = spop %124 }
 0x123   :  { %s80_s12 = smul.f32 %s125_s9, %s300_s0 }
 0x125   :  { %v81_v51 = vstv %s80_s12 }
 0x126   :  { %v82_v55 = vmul.f32 %v81_v51, %v151_v0  ;;  %v83_v56 = vmul.f32 %v81_v51, %v156_v1  ;;  %v84_v57 = vmul.f32 %v81_v51, %v161_v2  ;;  %v85_v58 = vmul.f32 %v81_v51, %v166_v3  ;;  %v24_v2 = vld [vmem:[%s301_s1 + $0x48] sm:$0x3]  ;;  %v25_v3 = vld [vmem:[%s301_s1 + $0x50] sm:$0x3] }
 0x127   :  { %v86_v62 = vmul.f32 %v81_v51, %v177_v7  ;;  %v87_v63 = vmul.f32 %v81_v51, %v184_v10  ;;  %v88_v0 = vmul.f32 %v81_v51, %v33_v13  ;;  %v89_v1 = vmul.f32 %v81_v51, %v34_v17 }
 0x128   :  { %v90_v5 = vmul.f32 %v81_v51, %v194_v14  ;;  %v91_v6 = vmul.f32 %v81_v51, %v204_v18  ;;  %v92_v7 = vmul.f32 %v81_v51, %v37_v22  ;;  %v93_v8 = vmul.f32 %v81_v51, %v38_v26 }
 0x129   :  { %v94_v9 = vadd.f32 %v82_v55, %v15_v48  ;;  %v95_v10 = vadd.f32 %v83_v56, %v16_v49  ;;  %v96_v11 = vadd.f32 %v84_v57, %v17_v50  ;;  %v97_v12 = vadd.f32 %v85_v58, %v18_v52 }
 0x12a   :  { %v98_v13 = vadd.f32 %v86_v62, %v19_v53  ;;  %v99_v15 = vadd.f32 %v87_v63, %v20_v54  ;;  %v100_v16 = vadd.f32 %v88_v0, %v21_v59  ;;  %v101_v17 = vadd.f32 %v89_v1, %v22_v60 }
 0x12b   :  { %v102_v19 = vadd.f32 %v90_v5, %v23_v61  ;;  %v103_v20 = vadd.f32 %v91_v6, %v24_v2  ;;  %v104_v21 = vadd.f32 %v92_v7, %v25_v3  ;;  %v105_v23 = vadd.f32 %v93_v8, %v26_v4  ;;  %106 = vst [vmem:[%s302_s3] sm:$0xff] %v94_v9 }
 0x12c   :  { %107 = vst [vmem:[%s302_s3 + $0x8] sm:$0xff] %v95_v10  ;;  %108 = vst [vmem:[%s302_s3 + $0x10] sm:$0xff] %v96_v11 }
 0x12d   :  { %109 = vst [vmem:[%s302_s3 + $0x18] sm:$0xff] %v97_v12  ;;  %110 = vst [vmem:[%s302_s3 + $0x20] sm:$0xff] %v98_v13 }
 0x12e   :  { %111 = vst [vmem:[%s302_s3 + $0x28] sm:$0xff] %v99_v15  ;;  %112 = vst [vmem:[%s302_s3 + $0x30] sm:$0xff] %v100_v16 }
 0x12f   :  { %113 = vst [vmem:[%s302_s3 + $0x38] sm:$0xff] %v101_v17  ;;  %114 = vst [vmem:[%s302_s3 + $0x40] sm:$0x3] %v102_v19 }
 0x130   :  { %115 = vst [vmem:[%s302_s3 + $0x48] sm:$0x3] %v103_v20  ;;  %116 = vst [vmem:[%s302_s3 + $0x50] sm:$0x3] %v104_v21 }
 0x131   :  { %117 = vst [vmem:[%s302_s3 + $0x58] sm:$0x3] %v105_v23 }

</bundles_post_ra>
